<compile_context>
chip_gen: v7x
topology: tpu7x:2x2x1
jax: 0.10.0
libtpu: 0.0.40
codegen_flags: <defaults>
</compile_context>

<pallas_src>
import jax
import jax.numpy as jnp
from jax.experimental import pallas as pl
from jax.experimental.pallas import tpu as pltpu


def _round_up(x, m):
    return ((x + m - 1) // m) * m


def coupling_head_kernel(x_ref, w1_ref, shift_ref, w2_ref, b2_ref, o_ref):
    # x_ref:     (1, C_in, tn)  channels on sublanes, pixels on lanes
    # w1_ref:    (mid, C_in)    conv1 weight with BN scale folded in
    # shift_ref: (mid, 1)       folded BN shift = beta - mean * scale
    # w2_ref:    (nout, mid)    conv2 weight
    # b2_ref:    (nout, 1)      conv2 bias
    # o_ref:     (1, nout, tn)  lane-dense output tile
    x = x_ref[0]                                                         # (C_in, tn)
    h = jnp.dot(w1_ref[...], x, preferred_element_type=jnp.float32)     # conv1 + BN scale
    h = jnp.maximum(h + shift_ref[...], 0.0)                            # BN shift + ReLU
    # Tiny K=mid matmul: kernel is HBM-bound, MXU is nowhere near the binding
    # unit, so a plain dot is fine here.
    o = jnp.dot(w2_ref[...], h, preferred_element_type=jnp.float32)     # conv2
    o_ref[0] = (o + b2_ref[...]).astype(o_ref.dtype)


def coupling_head_forward(x_nchw, params, *, tn=2048):
    """x_nchw: (N, C_in, H, W) float32. Returns (N, nout, H, W) float32."""
    w1_folded, bn_shift, w2, b2 = params
    N, C_in, H, W = x_nchw.shape
    mid = w1_folded.shape[0]
    nout = w2.shape[0]
    P = H * W

    # Free reshape: channels remain the second-minor axis, pixels are the lane axis.
    x_rows = x_nchw.reshape(N, C_in, P)

    # Pick the lane tile: as large as requested but never larger than the
    # 128-aligned pixel count; pad pixels once in the wrapper if needed so the
    # grid divides evenly (no divisibility assert on N*H*W).
    tn_eff = min(tn, _round_up(P, 128))
    P_pad = _round_up(P, tn_eff)
    if P_pad != P:
        x_rows = jnp.pad(x_rows, ((0, 0), (0, 0), (0, P_pad - P)))

    grid = (N, P_pad // tn_eff)

    out = pl.pallas_call(
        coupling_head_kernel,
        out_shape=jax.ShapeDtypeStruct((N, nout, P_pad), jnp.float32),
        grid_spec=pltpu.PrefetchScalarGridSpec(
            num_scalar_prefetch=0,
            grid=grid,
            in_specs=[
                pl.BlockSpec((1, C_in, tn_eff), lambda n, p: (n, 0, p)),
                pl.BlockSpec((mid, C_in), lambda n, p: (0, 0)),
                pl.BlockSpec((mid, 1), lambda n, p: (0, 0)),
                pl.BlockSpec((nout, mid), lambda n, p: (0, 0)),
                pl.BlockSpec((nout, 1), lambda n, p: (0, 0)),
            ],
            out_specs=pl.BlockSpec((1, nout, tn_eff), lambda n, p: (n, 0, p)),
        ),
        compiler_params=pltpu.CompilerParams(
            dimension_semantics=("parallel", "parallel")),
    )(x_rows, w1_folded, bn_shift, w2, b2)

    if P_pad != P:
        out = out[:, :, :P]
    return out.reshape(N, nout, H, W)


def init_raw_params(key, edge_nin, node_nin, nout, eps=1e-5):
    """Raw Conv/BN parameters matching the PyTorch module (eval mode)."""
    c_in = edge_nin + node_nin
    mid = node_nin // 2
    k1, k2, k3, k4, k5, k6, k7 = jax.random.split(key, 7)

    # Conv2d(c_in, mid, 1, bias=False): weight (mid, c_in, 1, 1) -> (mid, c_in)
    w1 = jax.random.normal(k1, (mid, c_in), jnp.float32) * 0.1
    # BatchNorm2d(mid) inference parameters
    gamma = 1.0 + 0.1 * jax.random.normal(k2, (mid,), jnp.float32)
    beta = 0.1 * jax.random.normal(k3, (mid,), jnp.float32)
    mean = 0.1 * jax.random.normal(k4, (mid,), jnp.float32)
    var = jnp.abs(jax.random.normal(k5, (mid,), jnp.float32)) + 0.5
    # Conv2d(mid, nout, 1, bias=True): weight (nout, mid, 1, 1) -> (nout, mid)
    w2 = jax.random.normal(k6, (nout, mid), jnp.float32) * 0.1
    b2 = 0.1 * jax.random.normal(k7, (nout,), jnp.float32)

    return dict(w1=w1, gamma=gamma, beta=beta, mean=mean, var=var,
                w2=w2, b2=b2, eps=eps)


def fold_params(raw):
    """Fold BN (eval) scale into conv1 weight; keep shift as a broadcast add."""
    scale = raw["gamma"] / jnp.sqrt(raw["var"] + raw["eps"])
    shift = raw["beta"] - raw["mean"] * scale
    w1_folded = raw["w1"] * scale[:, None]          # (mid, c_in)
    return (w1_folded, shift[:, None], raw["w2"], raw["b2"][:, None])


def reference_forward(x_nchw, raw):
    """Plain JAX reference with unfused conv -> BN -> ReLU -> conv semantics."""
    N, C_in, H, W = x_nchw.shape
    x = x_nchw.reshape(N, C_in, -1)                                    # (N, C_in, P)
    h = jnp.einsum("mc,ncp->nmp", raw["w1"], x)                        # conv1
    scale = raw["gamma"] / jnp.sqrt(raw["var"] + raw["eps"])
    shift = raw["beta"] - raw["mean"] * scale
    h = h * scale[None, :, None] + shift[None, :, None]                # BatchNorm2d
    h = jnp.maximum(h, 0.0)                                            # ReLU
    o = jnp.einsum("om,nmp->nop", raw["w2"], h) + raw["b2"][None, :, None]
    return o.reshape(N, -1, H, W)


if __name__ == "__main__":
    key = jax.random.PRNGKey(0)
    kx, kp = jax.random.split(key)

    edge_nin, node_nin, nout = 8, 8, 4   # C_in = 16, mid = 4
    N, H, W = 2, 16, 16
    C_in = edge_nin + node_nin

    x = jax.random.normal(kx, (N, C_in, H, W), jnp.float32)
    raw = init_raw_params(kp, edge_nin, node_nin, nout)
    params = fold_params(raw)

    out = coupling_head_forward(x, params, tn=2048)
    out = jax.block_until_ready(out)

    ref = reference_forward(x, raw)
    assert out.shape == (N, nout, H, W)
    assert jnp.allclose(out, ref, atol=1e-4, rtol=1e-4)

    print("KERNEL_OK")
</pallas_src>

<mosaic_0001>
module attributes {stable_mosaic.version = 11 : i64} {
  func.func @coupling_head_kernel(%arg0: i32, %arg1: i32, %arg2: memref<1x16x256xf32, #tpu.memory_space<vmem>>, %arg3: memref<4x16xf32, #tpu.memory_space<vmem>>, %arg4: memref<4x1xf32, #tpu.memory_space<vmem>>, %arg5: memref<4x4xf32, #tpu.memory_space<vmem>>, %arg6: memref<4x1xf32, #tpu.memory_space<vmem>>, %arg7: memref<1x4x256xf32, #tpu.memory_space<vmem>>) attributes {dimension_semantics = [#tpu.dimension_semantics<parallel>, #tpu.dimension_semantics<parallel>], iteration_bounds = array<i64: 2, 1>, scalar_prefetch = 0 : i64, scratch_operands = 0 : i64, tpu.core_type = #tpu.core_type<tc>, window_params = [{transform_indices = @transform_0, window_bounds = array<i64: 1, 16, 256>}, {pipeline_mode = #tpu.pipeline_mode<synchronous>, transform_indices = @transform_1, window_bounds = array<i64: 4, 16>}, {pipeline_mode = #tpu.pipeline_mode<synchronous>, transform_indices = @transform_2, window_bounds = array<i64: 4, 1>}, {pipeline_mode = #tpu.pipeline_mode<synchronous>, transform_indices = @transform_3, window_bounds = array<i64: 4, 4>}, {pipeline_mode = #tpu.pipeline_mode<synchronous>, transform_indices = @transform_4, window_bounds = array<i64: 4, 1>}, {transform_indices = @transform_5, window_bounds = array<i64: 1, 4, 256>}]} {
    %c0 = arith.constant 0 : index
    %c0_0 = arith.constant 0 : index
    %c0_1 = arith.constant 0 : index
    %0 = vector.load %arg2[%c0, %c0_0, %c0_1] : memref<1x16x256xf32, #tpu.memory_space<vmem>>, vector<1x16x256xf32>
    %1 = vector.shape_cast %0 : vector<1x16x256xf32> to vector<16x256xf32>
    %c0_2 = arith.constant 0 : index
    %c0_3 = arith.constant 0 : index
    %2 = vector.load %arg3[%c0_2, %c0_3] : memref<4x16xf32, #tpu.memory_space<vmem>>, vector<4x16xf32>
    %cst = arith.constant dense<0.000000e+00> : vector<4x256xf32>
    %3 = tpu.matmul %2, %1, %cst {dimension_numbers = #tpu.dot_dimension_numbers<[1], [0], [0], [1], [0, 0, 1, 1], [], []>} : vector<4x16xf32>, vector<16x256xf32>, vector<4x256xf32> -> vector<4x256xf32>
    %c0_4 = arith.constant 0 : index
    %c0_5 = arith.constant 0 : index
    %4 = vector.load %arg4[%c0_4, %c0_5] : memref<4x1xf32, #tpu.memory_space<vmem>>, vector<4x1xf32>
    %5 = vector.broadcast %4 : vector<4x1xf32> to vector<4x256xf32>
    %6 = arith.addf %3, %5 : vector<4x256xf32>
    %cst_6 = arith.constant 0.000000e+00 : f32
    %7 = vector.broadcast %cst_6 : f32 to vector<4x256xf32>
    %8 = arith.maximumf %6, %7 : vector<4x256xf32>
    %c0_7 = arith.constant 0 : index
    %c0_8 = arith.constant 0 : index
    %9 = vector.load %arg5[%c0_7, %c0_8] : memref<4x4xf32, #tpu.memory_space<vmem>>, vector<4x4xf32>
    %cst_9 = arith.constant dense<0.000000e+00> : vector<4x256xf32>
    %10 = tpu.matmul %9, %8, %cst_9 {dimension_numbers = #tpu.dot_dimension_numbers<[1], [0], [0], [1], [0, 0, 1, 1], [], []>} : vector<4x4xf32>, vector<4x256xf32>, vector<4x256xf32> -> vector<4x256xf32>
    %c0_10 = arith.constant 0 : index
    %c0_11 = arith.constant 0 : index
    %11 = vector.load %arg6[%c0_10, %c0_11] : memref<4x1xf32, #tpu.memory_space<vmem>>, vector<4x1xf32>
    %12 = vector.broadcast %11 : vector<4x1xf32> to vector<4x256xf32>
    %13 = arith.addf %10, %12 : vector<4x256xf32>
    %c0_12 = arith.constant 0 : index
    %c0_13 = arith.constant 0 : index
    %c0_14 = arith.constant 0 : index
    %14 = vector.load %arg7[%c0_12, %c0_13, %c0_14] : memref<1x4x256xf32, #tpu.memory_space<vmem>>, vector<1x4x256xf32>
    %15 = vector.shape_cast %14 : vector<1x4x256xf32> to vector<4x256xf32>
    %16 = vector.shape_cast %13 : vector<4x256xf32> to vector<1x4x256xf32>
    tpu.vector_store %arg7[%c0_12, %c0_13, %c0_14], %16 {strides = array<i32>} : memref<1x4x256xf32, #tpu.memory_space<vmem>>, vector<1x4x256xf32>,
    return
  }
  func.func @transform_0(%arg0: i32, %arg1: i32) -> (i32, i32, i32) {
    %c0_i32 = arith.constant 0 : i32
    %c0_i32_0 = arith.constant 0 : i32
    return %arg0, %c0_i32, %arg1 : i32, i32, i32
  }
  func.func @transform_1(%arg0: i32, %arg1: i32) -> (i32, i32) {
    %c0_i32 = arith.constant 0 : i32
    %c0_i32_0 = arith.constant 0 : i32
    %c0_i32_1 = arith.constant 0 : i32
    return %c0_i32, %c0_i32_0 : i32, i32
  }
  func.func @transform_2(%arg0: i32, %arg1: i32) -> (i32, i32) {
    %c0_i32 = arith.constant 0 : i32
    %c0_i32_0 = arith.constant 0 : i32
    %c0_i32_1 = arith.constant 0 : i32
    return %c0_i32, %c0_i32_0 : i32, i32
  }
  func.func @transform_3(%arg0: i32, %arg1: i32) -> (i32, i32) {
    %c0_i32 = arith.constant 0 : i32
    %c0_i32_0 = arith.constant 0 : i32
    %c0_i32_1 = arith.constant 0 : i32
    return %c0_i32, %c0_i32_0 : i32, i32
  }
  func.func @transform_4(%arg0: i32, %arg1: i32) -> (i32, i32) {
    %c0_i32 = arith.constant 0 : i32
    %c0_i32_0 = arith.constant 0 : i32
    %c0_i32_1 = arith.constant 0 : i32
    return %c0_i32, %c0_i32_0 : i32, i32
  }
  func.func @transform_5(%arg0: i32, %arg1: i32) -> (i32, i32, i32) {
    %c0_i32 = arith.constant 0 : i32
    %c0_i32_0 = arith.constant 0 : i32
    return %arg0, %c0_i32, %arg1 : i32, i32, i32
  }
}

</mosaic_0001>

<bundles_post_ra>
// kernel: tpu_custom_call.1
= control target key start
LH: loop header
LB: loop body
LE: loop exit
PB: predicated region body
PF: predicated region fallthrough
CT: control target
= control target key end

     0   :  { %10 = vsyncpa [#allocation3], 0  ;;  %s974_s0 = inlined_call_operand.hbm [shape: f32[2,16,256], index: 0, kind: input, shape index: {}]   ;;  %s975_s1 = inlined_call_operand.vmem [shape: f32[4,16], index: 1, kind: input, shape index: {}]   ;;  %s976_s2 = inlined_call_operand.vmem [shape: f32[4,1], index: 2, kind: input, shape index: {}]   ;;  %s977_s3 = inlined_call_operand.vmem [shape: f32[4,4], index: 3, kind: input, shape index: {}]   ;;  %s978_s4 = inlined_call_operand.vmem [shape: f32[4,1], index: 4, kind: input, shape index: {}]   ;;  %s979_s5 = inlined_call_operand.hbm [shape: f32[2,4,256], index: 5, kind: output, shape index: {}]  }
   0x1   :  { %12 = vsyncpa [#allocation3 + $0x1], 0 }
   0x2   :  { %13 = vsyncpa [#allocation4], 0 }
   0x3   :  { %15 = vsyncpa [#allocation4 + $0x1], 0  ;;  %s788_s18 = smov 0   ;;  %s790_s19 = smov 0  }
   0x4   :  { %s792_s20 = smov 0   ;;  %s794_s21 = smov 0  }
   0x5   :  { %s796_s22 = smov 0   ;;  %s798_s23 = smov 0  }
   0x6 LB: > { %s546_s24 = sadd.s32 4294967295, %s750_s23   ;;  %s547_s25 = sadd.s32 4294967294, %s750_s23   ;;  %s750_s23 = sphi %s798_s23, %s21_s23   ;;  %s746_s22 = sphi %s796_s22, %s994_s22   ;;  %s742_s21 = sphi %s794_s21, %s993_s21   ;;  %s738_s20 = sphi %s792_s20, %s992_s20   ;;  %s734_s19 = sphi %s790_s19, %s991_s19   ;;  %s730_s18 = sphi %s788_s18, %s990_s18  }
   0x7   : > { %s33_s26 = sadd.s32 1, %s746_s22  ;;  %s42_s27 = sadd.s32 1, %s738_s20 }
   0x8   : > { %p35_p0 = scmp.ge.s32.totalorder %s33_s26, 2  ;;  %p49_p1 = scmp.ne.s32.totalorder %s738_s20, %s734_s19 }
   0x9   : > { %p50_p2 = scmp.eq.s32.totalorder %s750_s23, 0  ;;  %p55_p3 = scmp.ne.s32.totalorder %s734_s19, %s730_s18 }
   0xa   : > { %s996_s26 = smov (%p35_p0, %s33_s26), 0  ;;  %p56_p5 = scmp.eq.s32.totalorder %s546_s24, 0 }
   0xb   : > { %p829_p4 = por %p50_p2, %p49_p1  ;;  %s37_s29 = ssub.s32 %s746_s22, %s996_s26 }
   0xc   : > { %p165_p6 = scmp.eq.s32.totalorder %s546_s24, 1  ;;  %p40_p7 = scmp.eq.s32.totalorder %s37_s29, 0 }
   0xd   : > { %p835_p8 = por %p56_p5, %p55_p3  ;;  %p171_p10 = scmp.eq.s32.totalorder %s547_s25, 1 }
   0xe   : > { %p839_p9 = por %p165_p6, %p49_p1  ;;  %p583_p13 = scmp.lt.s32.totalorder %s750_s23, 2 }
   0xf   : > { %s844_s7 = scalar_select %p40_p7, %s738_s20, %s42_s27  }
  0x10   : > { %s983_s6 = scalar_select %p839_p9, 1, 0 }
  0x11   : > { %p846_p11 = por %p171_p10, %p55_p3  ;;  %s203_s9 = sand.u32 1, %s738_s20  }
  0x12   : > { %s550_s10 = sshll.u32 %s203_s9, 5  ;;  %s565_s11 = sshll.u32 %s746_s22, 9 }
  0x13   : > { %s984_s8 = scalar_select %p846_p11, 1, 0 }
  0x14   : > { %s857_s14 = scalar_lea.hbm %s974_s0, %s565_s11  ;;  %s207_s15 = scalar_lea.vmem [#allocation2], %s550_s10 }
  0x15   : > { %s216_s16 = sshll.u32 %s207_s15, 4  ;;  %p863_p0 = pnand %p583_p13, %p829_p4  ;;  %s859_s16 = int_to_ptr.vmem [resolvable:$true] %s216_s16 }
  0x16   : > { %s868_s24 = scalar_lea.sflag [#allocation3], %s203_s9  ;;  %s638_s25 = scalar_lea.hbm %s857_s14, 512 }
  0x17   : > { %p639_p2 = scmp.ne.s32.totalorder %s857_s14, %s638_s25  ;;  %p640_p3 = pneg %p863_p0 }
  0x18   : > { %s643_s28 = scalar_lea.hbm %s974_s0, 1024  ;;  %p644_p4 = scmp.lt.u32.totalorder %s857_s14, %s974_s0 }
  0x19   : > { %p641_p5 = pnand %p640_p3, %p639_p2  ;;  %p645_p7 = scmp.lt.u32.totalorder %s643_s28, %s638_s25 }
  0x1a   : > { %p647_p13 = scmp.lt.u32.totalorder %s638_s25, %s857_s14 }
  0x1b   : > { %p642_p6 = pneg %p641_p5  ;;  %p646_p10 = por %p645_p7, %p644_p4 }
  0x1d   : > { %p648_p12 = por %p647_p13, %p646_p10 }
  0x1f   : > { %p649_p1 = pnand %p648_p12, %p642_p6 }
  0x21   : > { %652 = shalt.err (!%p649_p1)
}
  0x22   : > { %s653_s9 = scalar_lea.vmem %s859_s16, 512  ;;  %s752_s12 = smov [#allocation2]  }
  0x23   : > { %p654_p2 = scmp.ne.s32.totalorder %s859_s16, %s653_s9  ;;  %s658_s13 = sshll.u32 %s752_s12, 4  ;;  %s659_s13 = int_to_ptr.vmem [resolvable:$false] %s658_s13 }
  0x24   : > { %s660_s15 = scalar_lea.vmem %s659_s13, 1024  ;;  %p661_p9 = scmp.lt.s32.totalorder %s859_s16, %s659_s13 }
  0x25   : > { %p656_p5 = pnand %p654_p2, %p640_p3  ;;  %p662_p4 = scmp.lt.s32.totalorder %s660_s15, %s653_s9 }
  0x27   : > { %p657_p11 = pneg %p656_p5  ;;  %p663_p7 = por %p662_p4, %p661_p9 }
  0x29   : > { %p664_p10 = pnand %p663_p7, %p657_p11 }
  0x2b   : > { %667 = shalt.err (!%p664_p10)
}
  0x2c   : > { %s753_s25 = smov 256   ;;  %s754_s27 = smov 16  }
  0x2d   : > { %578 = dma.hbm_to_vmem [thread:$0]  (!%p863_p0), %s857_s14, 512, %s859_s16, %s868_s24, %s753_s25, %s753_s25, %s754_s27  }
  0x2e   : > { %p224_p12 = scmp.lt.s32.totalorder %s750_s23, 3  ;;  %p986_p1 = scmp.ge.s32.totalorder %s750_s23, 1 }
  0x30   : > { %p225_p3 = pnand %p986_p1, %p224_p12 }
  0x31   : > { %s900_s29 = sand.u32 (!%p225_p3), 1, %s734_s19  }
  0x32   : > { %228 = sbr.rel (%p225_p3) target bundleno = 515 (0x203), region = 40  ;;  %s554_s28 = sshll.u32 (!%p225_p3), %s900_s29, 5 }
  0x33   : > { %s231_s10 = scalar_lea.sflag (!%p225_p3), [#allocation3], %s900_s29  ;;  %s234_s11 = scalar_lea.vmem (!%p225_p3), [#allocation2], %s554_s28 }
  0x39   : > { %721 = dma.done.wait (%p835_p8), %s231_s10, 512  }
  0x3a   : > { %723 = vsyncadd (%p835_p8), %s231_s10, 4294966784  ;;  %v755_v0 = vmov 0.0   ;;  %v756_v1 = vmov 0   ;;  %v264_v2 = vld [vmem:[%s234_s11 + $0x8] sm:$0xff]  ;;  %v266_v3 = vld [vmem:[%s234_s11 + $0x18] sm:$0xff]  ;;  %vm274_vm0 = vcmask 130048  }
  0x3b   : > { %342 = vmatprep.mubr.f32.mxu0 %v755_v0  ;;  %637 = vset.pattern.permute.xlu0 %v756_v1  ;;  %v263_v4 = vld [vmem:[%s234_s11] sm:$0xff]  ;;  %v567_v5 = vpack.c.bf16 %v266_v3, %v264_v2  ;;  %v265_v6 = vld [vmem:[%s234_s11 + $0x10] sm:$0xff]  ;;  %vm362_vm1 = vcmask 1043456   ;;  %vm358_vm2 = vcmask 31744   ;;  %s555_s15 = sshll.u32 %s900_s29, 3  ;;  %s566_s25 = sshll.u32 %s742_s21, 7 }
  0x3c   : > { %433 = vmatprep.mubr.f32.mxu1 %v755_v0  ;;  %v268_v7 = vld [vmem:[%s976_s2] sm:$0xf]  ;;  %v569_v8 = vpack.c.bf16 %v265_v6, %v263_v4  ;;  %s260_s27 = scalar_lea.vmem [#allocation5], %s555_s15  ;;  %s925_s14 = scalar_lea.hbm %s979_s5, %s566_s25 }
  0x3d   : > { %271 = vperm.xlu0 %637, %v268_v7   ;;  %568 = vmatprep.subr.bf16.mxu0 %v567_v5  ;;  %v352_v9 = vld [vmem:[%s978_s4] sm:$0xf]  ;;  %s462_s28 = sshll.u32 %s260_s27, 4  ;;  %s446_s16 = scalar_lea.sflag [#allocation4], %s900_s29  ;;  %s927_s28 = int_to_ptr.vmem [resolvable:$true] %s462_s28 }
  0x3e   : > { %570 = vmatpush1.bf16.msra.mxu0 %v569_v8  ;;  %v267_v10 = vld [vmem:[%s975_s1] sm:$0xf]  ;;  %s668_s17 = scalar_lea.vmem %s927_s28, 128  ;;  %p987_p9 = scmp.ne.s32.totalorder %s983_s6, 0 }
  0x3f   : > { %v351_v18 = vld [vmem:[%s977_s3] sm:$0xf]  ;;  %p669_p8 = scmp.ne.s32.totalorder %s927_s28, %s668_s17  ;;  %s757_s21 = smov [#allocation5]  }
  0x40   : > { %s672_s30 = sshll.u32 %s757_s21, 4  ;;  %s673_s30 = int_to_ptr.vmem [resolvable:$false] %s672_s30 }
  0x41   : > { %355 = vperm.xlu0 %637, %v352_v9   ;;  %556 = vmatmul.mubr.msk.f32.vlgmr.msra.gmra.mrb[0].mxu0 %vm274_vm0, %v267_v10  ;;  %p670_p11 = pnand %p669_p8, %p987_p9  ;;  %s674_s24 = scalar_lea.vmem %s673_s30, 256 }
  0x42   : > { %p675_p6 = scmp.lt.s32.totalorder %s927_s28, %s673_s30  ;;  %p676_p13 = scmp.lt.s32.totalorder %s674_s24, %s668_s17 }
  0x43   : > { %p671_p0 = pneg %p670_p11 }
  0x44   : > { %p677_p2 = por %p676_p13, %p675_p6 }
  0x46   : > { %p678_p5 = pnand %p677_p2, %p671_p0 }
  0xbc   : > { %v272_v11 = vpop.permute.xlu0 %271 }
  0xc0   : > { %v356_v19 = vpop.permute.xlu0 %355 }
 0x114   : > { %v344_v12 = vpop.f32.mrb[0].mxu0 }
 0x115   : > { %v345_v13 = vadd.f32 %v344_v12, %v272_v11  ;;  %v346_v14 = vpop.f32.mrb[1].mxu0 }
 0x116   : > { %v347_v15 = vadd.f32 %v346_v14, %v272_v11 }
 0x117   : > { %v349_v17 = vmax.f32 %v345_v13, 0.0 }
 0x118   : > { %v350_v16 = vmax.f32 %v347_v15, 0.0 }
 0x11a   : > { %557 = vmatprep.subr.msk.mxu1 %vm362_vm1, %v350_v16 }
 0x11b   : > { %558 = vmatpush1.msk.msra.mxu1 %vm362_vm1, %v349_v17 }
 0x11c   : > { %559 = vmatmul.mubr.msk.f32.vlgmr.msra.gmra.mrb[0].mxu1 %vm358_vm2, %v351_v18 }
 0x1ef   : > { %v435_v20 = vpop.f32.mrb[0].mxu1 }
 0x1f0   : > { %v436_v21 = vadd.f32 %v435_v20, %v356_v19  ;;  %v437_v22 = vpop.f32.mrb[1].mxu1 }
 0x1f1   : > { %v438_v23 = vadd.f32 %v437_v22, %v356_v19 }
 0x1f3   : > { %v442_v24 = vcombine.low %v436_v21, %v438_v23 }
 0x1f5   : > { %444 = vst [vmem:[%s260_s27] sm:$0xff] %v442_v24 }
 0x1f6   : > { %681 = shalt.err (!%p678_p5)
}
 0x1f7   : > { %s682_s29 = scalar_lea.hbm %s925_s14, 128  ;;  %s686_s13 = scalar_lea.hbm %s979_s5, 256 }
 0x1f8   : > { %p683_p4 = scmp.ne.s32.totalorder %s925_s14, %s682_s29  ;;  %p687_p12 = scmp.lt.u32.totalorder %s925_s14, %s979_s5 }
 0x1f9   : > { %p688_p1 = scmp.lt.u32.totalorder %s686_s13, %s682_s29  ;;  %p690_p8 = scmp.lt.u32.totalorder %s682_s29, %s925_s14 }
 0x1fa   : > { %p684_p7 = pnand %p683_p4, %p987_p9 }
 0x1fb   : > { %p689_p3 = por %p688_p1, %p687_p12 }
 0x1fc   : > { %p685_p10 = pneg %p684_p7 }
 0x1fd   : > { %p691_p11 = por %p690_p8, %p689_p3 }
 0x1ff   : > { %p692_p0 = pnand %p691_p11, %p685_p10 }
 0x201   : > { %695 = shalt.err (!%p692_p0)
}
 0x202   : > { %573 = dma.vmem_to_hbm [thread:$0]  (%p987_p9), %s927_s28, 128, %s925_s14, %s446_s16  }
 0x203 PF: > { %s474_s27 = sand.u32 1, %s730_s18   ;;  %p988_p6 = scmp.ne.s32.totalorder %s984_s8, 0 }
 0x204   : > { %p989_p13 = scmp.ge.s32.totalorder %s750_s23, 2  ;;  %s475_s10 = scalar_lea.sflag [#allocation4], %s474_s27 }
 0x206   : > { %p580_p2 = pnand %p989_p13, %p988_p6 }
 0x208   : > { %725 = dma.done.wait (!%p580_p2), %s475_s10, 128  }
 0x209   : > { %727 = vsyncadd (!%p580_p2), %s475_s10, 4294967168  ;;  %s21_s23 = sadd.s32 1, %s750_s23   ;;  %s990_s18 = smov %s734_s19 }
 0x20a   : > { %p18_p5 = scmp.ge.s32.totalorder %s21_s23, 4   ;;  %s991_s19 = smov %s738_s20 }
 0x20b   : > { %s992_s20 = smov %s844_s7  ;;  %s993_s21 = smov %s746_s22 }
 0x20c   : > { %s994_s22 = smov %s996_s26  ;;  %20 = sbr.rel (!%p18_p5) target bundleno = 6 (0x6), region = 85 }
 0x213   :  { %480 = vsyncpa [#allocation3], 1 }
 0x214   :  { %482 = vsyncpa [#allocation3 + $0x1], 1 }
 0x215   :  { %483 = vsyncpa [#allocation4], 1 }
 0x216   :  { %485 = vsyncpa [#allocation4 + $0x1], 1 }

</bundles_post_ra>
